<compile_context>
chip_gen: v7x
topology: tpu7x:2x2x1
jax: 0.10.0
libtpu: 0.0.40
codegen_flags: <defaults>
</compile_context>

<pallas_src>
import functools

import jax
import jax.numpy as jnp
from jax.experimental import pallas as pl
from jax.experimental.pallas import tpu as pltpu

T_SEQ = 6  # seq_len=6 is hard-coded in Forecaster.forward_by_stage

# ----------------------------------------------------------------------------
# Configuration (small synthetic shapes).
#   stage index -> (rnn_input_channels, rnn_hidden_channels, H, W, kernel, pad)
RNN_CFG = {
    4: (32, 32, 4, 4, 3, 1),
    3: (32, 32, 8, 8, 3, 1),
    2: (16, 16, 16, 16, 3, 1),
    1: (16, 16, 32, 32, 3, 1),
}
#   stage index -> list of subnet layers: (kind, Cin, Cout, k, stride, pad, act)
STAGE_CFG = {
    4: [("deconv", 32, 32, 3, 1, 1, "leaky")],
    3: [("deconv", 32, 16, 3, 1, 1, "leaky")],
    2: [("deconv", 16, 16, 3, 1, 1, "leaky")],
    1: [("conv", 16, 8, 3, 1, 1, "leaky"), ("conv", 8, 1, 1, 1, 0, None)],
}


def _row_chunk(H, W):
    """Rows per chunk so the f32 accumulator stays register-resident."""
    hc = max(1, min(H, 256 // max(W, 1)))
    while H % hc:
        hc -= 1
    return hc


def _pick_nb(N, Hp, Wp, budget_bytes=3 * 1024 * 1024):
    """Frames per grid step so the (lane-padded) input block stays small."""
    frame = Hp * (((Wp + 7) // 8) * 8) * 128 * 4
    for nb in range(N, 0, -1):
        if N % nb == 0 and nb * frame <= budget_bytes:
            return nb
    return 1


# ----------------------------------------------------------------------------
# Pallas kernels
# ----------------------------------------------------------------------------
def _convlstm_body(x_ref, h0_ref, c0_ref, wx_ref, wh_ref, b_ref, o_ref,
                   hpad_ref, c_ref, *, seq_len, pad, hc):
    """One batch element, full seq_len recurrence.

    x_ref:  (T*Hp, Wp, Cin) spatially pre-padded frames (None for stage 4)
    h0_ref, c0_ref: (H, W, Ch) initial states
    wx_ref: (KH, KW, Cin, 4*Ch) bf16 (None for stage 4); wh_ref: (KH,KW,Ch,4*Ch)
    b_ref:  (1, 4*Ch) f32
    o_ref:  (T*H, W, Ch) hidden state outputs (also read back as h_{t})
    hpad_ref: VMEM (Hp, Wp, Ch) zero-padded previous hidden state
    c_ref:    VMEM (H*W, Ch) cell state
    """
    H, W, Ch = h0_ref.shape
    KH, KW = wh_ref.shape[0], wh_ref.shape[1]
    P = pad
    Hp = H + 2 * P
    C4 = 4 * Ch
    has_x = x_ref is not None
    Cin = wx_ref.shape[2] if has_x else 0

    hpad_ref[...] = jnp.zeros(hpad_ref.shape, hpad_ref.dtype)
    hpad_ref[P:P + H, P:P + W, :] = h0_ref[...].astype(jnp.float32)
    c_ref[...] = c0_ref[...].astype(jnp.float32).reshape(H * W, Ch)
    bias = b_ref[...].astype(jnp.float32)  # (1, 4*Ch)

    def step(t, carry):
        # Row-chunked gate computation: the accumulator fits in vregs and all
        # chunks read the *previous* h (hpad is only updated after the chunks).
        for r0 in range(0, H, hc):
            mc = hc * W
            m0 = r0 * W
            acc = jnp.zeros((mc, C4), jnp.float32) + bias
            for kh in range(KH):
                for kw in range(KW):
                    hp = hpad_ref[kh + r0:kh + r0 + hc, kw:kw + W, :]
                    hp = hp.reshape(mc, Ch).astype(jnp.bfloat16)
                    acc += jnp.dot(hp, wh_ref[kh, kw],
                                   preferred_element_type=jnp.float32)
                    if has_x:
                        xp = x_ref[pl.ds(t * Hp + kh + r0, hc), kw:kw + W, :]
                        xp = xp.reshape(mc, Cin).astype(jnp.bfloat16)
                        acc += jnp.dot(xp, wx_ref[kh, kw],
                                       preferred_element_type=jnp.float32)
            # torch.chunk order: i, f, g(tmp_c), o.  Full-width nonlinearities.
            sg = jax.nn.sigmoid(acc)
            tg = jnp.tanh(acc)
            gi = sg[:, 0 * Ch:1 * Ch]
            gf = sg[:, 1 * Ch:2 * Ch]
            gg = tg[:, 2 * Ch:3 * Ch]
            go = sg[:, 3 * Ch:4 * Ch]
            c_old = c_ref[m0:m0 + mc, :]
            c_new = gf * c_old + gi * gg
            h_new = go * jnp.tanh(c_new)
            c_ref[m0:m0 + mc, :] = c_new
            o_ref[pl.ds(t * H + r0, hc), :, :] = (
                h_new.reshape(hc, W, Ch).astype(o_ref.dtype))
        # Refresh the padded hidden state from the rows we just wrote.
        hpad_ref[P:P + H, P:P + W, :] = o_ref[pl.ds(t * H, H), :, :]
        return carry

    jax.lax.fori_loop(0, seq_len, step, 0)


def _convlstm_kernel_x(x_ref, h0_ref, c0_ref, wx_ref, wh_ref, b_ref, o_ref,
                       hpad_ref, c_ref, *, seq_len, pad, hc):
    _convlstm_body(x_ref, h0_ref, c0_ref, wx_ref, wh_ref, b_ref, o_ref,
                   hpad_ref, c_ref, seq_len=seq_len, pad=pad, hc=hc)


def _convlstm_kernel_nox(h0_ref, c0_ref, wh_ref, b_ref, o_ref, hpad_ref, c_ref,
                         *, seq_len, pad, hc):
    # Stage 4: inputs is None -> zero frames, so the wx path vanishes entirely.
    _convlstm_body(None, h0_ref, c0_ref, None, wh_ref, b_ref, o_ref,
                   hpad_ref, c_ref, seq_len=seq_len, pad=pad, hc=hc)


def _conv_kernel(x_ref, w_ref, b_ref, o_ref, *, hc, slope):
    """NB frames per grid step. x_ref: (NB, Hp, Wp, Cin) pre-padded;
    w_ref: (KH, KW, Cin, Cout) bf16; b_ref: (1, Cout); o_ref: (NB, Ho, Wo, Cout)."""
    NB, Ho, Wo, Cout = o_ref.shape
    KH, KW, Cin, _ = w_ref.shape

    def frame(n, carry):
        for r0 in range(0, Ho, hc):
            mc = hc * Wo
            acc = jnp.zeros((mc, Cout), jnp.float32) + b_ref[...]
            for kh in range(KH):
                for kw in range(KW):
                    xp = x_ref[n, kh + r0:kh + r0 + hc, kw:kw + Wo, :]
                    xp = xp.reshape(mc, Cin).astype(jnp.bfloat16)
                    acc += jnp.dot(xp, w_ref[kh, kw],
                                   preferred_element_type=jnp.float32)
            if slope is not None:
                acc = jnp.where(acc >= 0, acc, acc * slope)
            o_ref[n, r0:r0 + hc, :, :] = (
                acc.reshape(hc, Wo, Cout).astype(o_ref.dtype))
        return carry

    jax.lax.fori_loop(0, NB, frame, 0)


def _conv_head_kernel(x_ref, w1_ref, b1_ref, w2_ref, b2_ref, o_ref, *, hc, slope):
    """Fused stage-1 head: 3x3 conv (Cin->C1) + LeakyReLU + 1x1 conv (C1->1).
    x_ref: (NB, Hp, Wp, Cin); w1 bf16 (KH,KW,Cin,C1); w2 f32 (1, C1);
    o_ref: (NB, Ho, Wo, 1)."""
    NB, Ho, Wo, _ = o_ref.shape
    KH, KW, Cin, C1 = w1_ref.shape

    def frame(n, carry):
        for r0 in range(0, Ho, hc):
            mc = hc * Wo
            acc = jnp.zeros((mc, C1), jnp.float32) + b1_ref[...]
            for kh in range(KH):
                for kw in range(KW):
                    xp = x_ref[n, kh + r0:kh + r0 + hc, kw:kw + Wo, :]
                    xp = xp.reshape(mc, Cin).astype(jnp.bfloat16)
                    acc += jnp.dot(xp, w1_ref[kh, kw],
                                   preferred_element_type=jnp.float32)
            acc = jnp.where(acc >= 0, acc, acc * slope)
            y = jnp.sum(acc * w2_ref[...], axis=1, keepdims=True) + b2_ref[...]
            o_ref[n, r0:r0 + hc, :, :] = y.reshape(hc, Wo, 1).astype(o_ref.dtype)
        return carry

    jax.lax.fori_loop(0, NB, frame, 0)


# ----------------------------------------------------------------------------
# Pallas wrappers
# ----------------------------------------------------------------------------
def convlstm_forward(x_seq, h0, c0, wx, wh, b, *, pad):
    """x_seq: (B, T, H, W, Cin) or None; h0, c0: (B, H, W, Ch) -> (B,T,H,W,Ch)."""
    B, H, W, Ch = h0.shape
    T = T_SEQ
    KH, KW = wh.shape[0], wh.shape[1]
    Hp, Wp = H + 2 * pad, W + 2 * pad
    C4 = 4 * Ch
    hc = _row_chunk(H, W)

    wh_b = wh.astype(jnp.bfloat16)
    b_f = b.astype(jnp.float32)
    scratch = [pltpu.VMEM((Hp, Wp, Ch), jnp.float32),
               pltpu.VMEM((H * W, Ch), jnp.float32)]

    if x_seq is not None:
        Cin = x_seq.shape[-1]
        xpad = jnp.pad(x_seq, ((0, 0), (0, 0), (pad, pad), (pad, pad), (0, 0)))
        xflat = xpad.reshape(B, T * Hp, Wp, Cin)  # fold (T, Hp) -> rank 4
        kernel = functools.partial(_convlstm_kernel_x, seq_len=T, pad=pad, hc=hc)
        in_specs = [
            pl.BlockSpec((None, T * Hp, Wp, Cin), lambda bb: (bb, 0, 0, 0)),
            pl.BlockSpec((None, H, W, Ch), lambda bb: (bb, 0, 0, 0)),
            pl.BlockSpec((None, H, W, Ch), lambda bb: (bb, 0, 0, 0)),
            pl.BlockSpec((KH, KW, Cin, C4), lambda bb: (0, 0, 0, 0)),
            pl.BlockSpec((KH, KW, Ch, C4), lambda bb: (0, 0, 0, 0)),
            pl.BlockSpec((1, C4), lambda bb: (0, 0)),
        ]
        args = (xflat, h0, c0, wx.astype(jnp.bfloat16), wh_b, b_f)
    else:
        kernel = functools.partial(_convlstm_kernel_nox, seq_len=T, pad=pad, hc=hc)
        in_specs = [
            pl.BlockSpec((None, H, W, Ch), lambda bb: (bb, 0, 0, 0)),
            pl.BlockSpec((None, H, W, Ch), lambda bb: (bb, 0, 0, 0)),
            pl.BlockSpec((KH, KW, Ch, C4), lambda bb: (0, 0, 0, 0)),
            pl.BlockSpec((1, C4), lambda bb: (0, 0)),
        ]
        args = (h0, c0, wh_b, b_f)

    out = pl.pallas_call(
        kernel,
        out_shape=jax.ShapeDtypeStruct((B, T * H, W, Ch), jnp.float32),
        grid_spec=pltpu.PrefetchScalarGridSpec(
            num_scalar_prefetch=0,
            grid=(B,),
            in_specs=in_specs,
            out_specs=pl.BlockSpec((None, T * H, W, Ch), lambda bb: (bb, 0, 0, 0)),
            scratch_shapes=scratch,
        ),
        compiler_params=pltpu.CompilerParams(
            dimension_semantics=("parallel",),
            vmem_limit_bytes=32 * 1024 * 1024),
    )(*args)
    return out.reshape(B, T, H, W, Ch)


def conv2d_batched(x, w, b, *, pad, slope):
    """x: (N, H, W, Cin); w: (KH, KW, Cin, Cout) f32; b: (1, Cout)."""
    N, H, W, Cin = x.shape
    KH, KW, _, Cout = w.shape
    Ho, Wo = H + 2 * pad - KH + 1, W + 2 * pad - KW + 1
    Hp, Wp = H + 2 * pad, W + 2 * pad
    xpad = jnp.pad(x, ((0, 0), (pad, pad), (pad, pad), (0, 0)))
    nb = _pick_nb(N, Hp, Wp)
    hc = _row_chunk(Ho, Wo)

    kernel = functools.partial(_conv_kernel, hc=hc, slope=slope)
    return pl.pallas_call(
        kernel,
        out_shape=jax.ShapeDtypeStruct((N, Ho, Wo, Cout), jnp.float32),
        grid_spec=pltpu.PrefetchScalarGridSpec(
            num_scalar_prefetch=0,
            grid=(N // nb,),
            in_specs=[
                pl.BlockSpec((nb, Hp, Wp, Cin), lambda n: (n, 0, 0, 0)),
                pl.BlockSpec((KH, KW, Cin, Cout), lambda n: (0, 0, 0, 0)),
                pl.BlockSpec((1, Cout), lambda n: (0, 0)),
            ],
            out_specs=pl.BlockSpec((nb, Ho, Wo, Cout), lambda n: (n, 0, 0, 0)),
        ),
        compiler_params=pltpu.CompilerParams(
            dimension_semantics=("parallel",),
            vmem_limit_bytes=32 * 1024 * 1024),
    )(xpad, w.astype(jnp.bfloat16), b.astype(jnp.float32))


def conv2d_head(x, w1, b1, w2, b2, *, pad, slope):
    """Fused 3x3 conv + LeakyReLU + 1x1 conv (Cout=1)."""
    N, H, W, Cin = x.shape
    KH, KW, _, C1 = w1.shape
    Ho, Wo = H + 2 * pad - KH + 1, W + 2 * pad - KW + 1
    Hp, Wp = H + 2 * pad, W + 2 * pad
    xpad = jnp.pad(x, ((0, 0), (pad, pad), (pad, pad), (0, 0)))
    nb = _pick_nb(N, Hp, Wp)
    hc = _row_chunk(Ho, Wo)
    w2_row = w2[0, 0, :, 0].reshape(1, C1)  # (1,1,C1,1) -> (1, C1)

    kernel = functools.partial(_conv_head_kernel, hc=hc, slope=slope)
    return pl.pallas_call(
        kernel,
        out_shape=jax.ShapeDtypeStruct((N, Ho, Wo, 1), jnp.float32),
        grid_spec=pltpu.PrefetchScalarGridSpec(
            num_scalar_prefetch=0,
            grid=(N // nb,),
            in_specs=[
                pl.BlockSpec((nb, Hp, Wp, Cin), lambda n: (n, 0, 0, 0)),
                pl.BlockSpec((KH, KW, Cin, C1), lambda n: (0, 0, 0, 0)),
                pl.BlockSpec((1, C1), lambda n: (0, 0)),
                pl.BlockSpec((1, C1), lambda n: (0, 0)),
                pl.BlockSpec((1, 1), lambda n: (0, 0)),
            ],
            out_specs=pl.BlockSpec((nb, Ho, Wo, 1), lambda n: (n, 0, 0, 0)),
        ),
        compiler_params=pltpu.CompilerParams(
            dimension_semantics=("parallel",),
            vmem_limit_bytes=32 * 1024 * 1024),
    )(xpad, w1.astype(jnp.bfloat16), b1.astype(jnp.float32),
      w2_row.astype(jnp.float32), b2.astype(jnp.float32))


def upsample_nearest_2x(x):
    # nn.Upsample(mode='nearest', scale_factor=2) on NHWC — pure data movement.
    # TODO(synk): fuse the nearest-2x upsample into the conv kernel's read
    # indexing to avoid the HBM round trip of the 4x-sized activation.
    return jnp.repeat(jnp.repeat(x, 2, axis=1), 2, axis=2)


# ----------------------------------------------------------------------------
# Forecaster forward (JAX orchestration around the Pallas kernels)
# ----------------------------------------------------------------------------
def forward_by_stage(x_seq, state, sp, cfg):
    cin, ch, H, W, k, p = cfg
    h0, c0 = state  # NHWC (B, H, W, Ch)
    B = h0.shape[0]
    out = convlstm_forward(x_seq, h0, c0, sp["wx"], sp["wh"], sp["b"], pad=p)
    y = out.reshape((B * T_SEQ,) + out.shape[2:])  # torch.reshape((-1, c, h, w))
    layers = sp["subnet"]
    i = 0
    while i < len(layers):
        kind, w, bias, stride, pad_, act, ksz = layers[i]
        assert stride == 1
        if kind == "deconv":
            y = upsample_nearest_2x(y)
        slope = 0.2 if act == "leaky" else (0.0 if act == "relu" else None)
        fuse_head = (slope is not None and i + 1 < len(layers)
                     and layers[i + 1][0] == "conv" and layers[i + 1][6] == 1
                     and layers[i + 1][4] == 0 and layers[i + 1][5] is None
                     and layers[i + 1][1].shape[-1] == 1)
        if fuse_head:
            _, w2, b2, _, _, _, _ = layers[i + 1]
            y = conv2d_head(y, w, bias, w2, b2, pad=pad_, slope=slope)
            i += 2
        else:
            y = conv2d_batched(y, w, bias, pad=pad_, slope=slope)
            i += 1
    return y.reshape((B, T_SEQ) + y.shape[1:])


def forecaster_forward(params, hidden_states):
    # hidden_states[i] = (h, c) for rnn(i+1), NHWC
    x = forward_by_stage(None, hidden_states[-1], params[4], RNN_CFG[4])
    for i in list(range(1, 4))[::-1]:
        x = forward_by_stage(x, hidden_states[i - 1], params[i], RNN_CFG[i])
    return x  # (B, T, H, W, C) NHWC


# ----------------------------------------------------------------------------
# Deterministic parameter construction (torch layouts -> kernel layouts)
# ----------------------------------------------------------------------------
def _bf16_round(x):
    # Weights are used in bf16 on the MXU; keep the f32 reference copies equal
    # to the bf16-rounded values so the numerical check stays tight.
    return x.astype(jnp.bfloat16).astype(jnp.float32)


def init_params(key):
    params = {}
    for s in (4, 3, 2, 1):
        cin, ch, H, W, k, p = RNN_CFG[s]
        key, k1, k2 = jax.random.split(key, 3)
        # torch: nn.Conv2d(cin+ch, 4*ch, k) acting on cat([x, h], dim=1)
        w_all = jax.random.normal(k1, (4 * ch, cin + ch, k, k), jnp.float32) * 0.1
        b_all = jax.random.normal(k2, (4 * ch,), jnp.float32) * 0.1
        w_all = _bf16_round(w_all)
        wx = jnp.transpose(w_all[:, :cin], (2, 3, 1, 0))   # (k, k, cin, 4ch)
        wh = jnp.transpose(w_all[:, cin:], (2, 3, 1, 0))   # (k, k, ch, 4ch)
        layers = []
        for (kind, ci, co, kk, st, pp, act) in STAGE_CFG[s]:
            key, kw_, kb_ = jax.random.split(key, 3)
            w = jax.random.normal(kw_, (co, ci, kk, kk), jnp.float32) * 0.1
            w = _bf16_round(jnp.transpose(w, (2, 3, 1, 0)))  # (kk, kk, ci, co)
            bias = (jax.random.normal(kb_, (co,), jnp.float32) * 0.1).reshape(1, co)
            layers.append((kind, w, bias, st, pp, act, kk))
        params[s] = {"wx": wx, "wh": wh, "b": b_all.reshape(1, 4 * ch),
                     "subnet": layers}
    return params


# ----------------------------------------------------------------------------
# Pure-JAX reference (XLA convs) for a structural sanity check
# ----------------------------------------------------------------------------
def _conv_ref(x, w, pad):
    return jax.lax.conv_general_dilated(
        x, w, (1, 1), ((pad, pad), (pad, pad)),
        dimension_numbers=("NHWC", "HWIO", "NHWC"))


def forecaster_reference(params, hidden_states):
    def stage(x_seq, state, sp, cfg):
        cin, ch, H, W, k, p = cfg
        h, c = state
        B = h.shape[0]
        if x_seq is None:
            x_seq = jnp.zeros((B, T_SEQ, H, W, cin), jnp.float32)
        outs = []
        for t in range(T_SEQ):
            gates = (_conv_ref(x_seq[:, t], sp["wx"], p)
                     + _conv_ref(h, sp["wh"], p)
                     + sp["b"].reshape(1, 1, 1, -1))
            i = jax.nn.sigmoid(gates[..., 0 * ch:1 * ch])
            f = jax.nn.sigmoid(gates[..., 1 * ch:2 * ch])
            g = jnp.tanh(gates[..., 2 * ch:3 * ch])
            o = jax.nn.sigmoid(gates[..., 3 * ch:4 * ch])
            c = f * c + i * g
            h = o * jnp.tanh(c)
            outs.append(h)
        out = jnp.stack(outs, axis=1)
        y = out.reshape((B * T_SEQ,) + out.shape[2:])
        for (kind, w, bias, st, pp, act, kk) in sp["subnet"]:
            if kind == "deconv":
                y = jnp.repeat(jnp.repeat(y, 2, axis=1), 2, axis=2)
            y = _conv_ref(y, w, pp) + bias.reshape(1, 1, 1, -1)
            if act == "leaky":
                y = jnp.where(y >= 0, y, 0.2 * y)
            elif act == "relu":
                y = jnp.maximum(y, 0.0)
        return y.reshape((B, T_SEQ) + y.shape[1:])

    x = stage(None, hidden_states[-1], params[4], RNN_CFG[4])
    for i in list(range(1, 4))[::-1]:
        x = stage(x, hidden_states[i - 1], params[i], RNN_CFG[i])
    return x


# ----------------------------------------------------------------------------
if __name__ == "__main__":
    key = jax.random.PRNGKey(0)
    key, pk = jax.random.split(key)
    params = init_params(pk)

    B = 2
    hidden_states = []
    for s in (1, 2, 3, 4):
        cin, ch, H, W, k, p = RNN_CFG[s]
        key, kh_, kc_ = jax.random.split(key, 3)
        # torch layout (B, C, H, W) -> NHWC
        h = jnp.transpose(jax.random.normal(kh_, (B, ch, H, W), jnp.float32) * 0.5,
                          (0, 2, 3, 1))
        c = jnp.transpose(jax.random.normal(kc_, (B, ch, H, W), jnp.float32) * 0.5,
                          (0, 2, 3, 1))
        hidden_states.append((h, c))

    out_nhwc = forecaster_forward(params, hidden_states)      # (B, T, H, W, C)
    out = jnp.transpose(out_nhwc, (0, 1, 4, 2, 3))            # (B, T, C, H, W)
    out = jax.block_until_ready(out)

    assert out.shape == (B, T_SEQ, 1, 32, 32), out.shape
    assert bool(jnp.all(jnp.isfinite(out)))

    ref = forecaster_reference(params, hidden_states)
    ref = jnp.transpose(ref, (0, 1, 4, 2, 3))
    max_err = float(jnp.max(jnp.abs(out - ref)))
    assert max_err < 5e-2, f"mismatch vs reference: {max_err}"

    print("KERNEL_OK")
</pallas_src>

<mosaic_0001>
module attributes {stable_mosaic.version = 11 : i64} {
  func.func @_convlstm_kernel_nox(%arg0: i32, %arg1: memref<1x4x4x32xf32, #tpu.memory_space<vmem>>, %arg2: memref<1x4x4x32xf32, #tpu.memory_space<vmem>>, %arg3: memref<3x3x32x128xbf16, #tpu.memory_space<vmem>>, %arg4: memref<1x128xf32, #tpu.memory_space<vmem>>, %arg5: memref<1x24x4x32xf32, #tpu.memory_space<vmem>>, %arg6: memref<6x6x32xf32, #tpu.memory_space<vmem>>, %arg7: memref<16x32xf32, #tpu.memory_space<vmem>>) attributes {dimension_semantics = [#tpu.dimension_semantics<parallel>], iteration_bounds = array<i64: 2>, scalar_prefetch = 0 : i64, scratch_operands = 2 : i64, tpu.core_type = #tpu.core_type<tc>, window_params = [{transform_indices = @transform_0, window_bounds = array<i64: 1, 4, 4, 32>}, {transform_indices = @transform_1, window_bounds = array<i64: 1, 4, 4, 32>}, {pipeline_mode = #tpu.pipeline_mode<synchronous>, transform_indices = @transform_2, window_bounds = array<i64: 3, 3, 32, 128>}, {pipeline_mode = #tpu.pipeline_mode<synchronous>, transform_indices = @transform_3, window_bounds = array<i64: 1, 128>}, {transform_indices = @transform_4, window_bounds = array<i64: 1, 24, 4, 32>}]} {
    %cst = arith.constant 0.000000e+00 : f32
    %0 = vector.broadcast %cst : f32 to vector<6x6x32xf32>
    %c0 = arith.constant 0 : index
    %c0_0 = arith.constant 0 : index
    %c0_1 = arith.constant 0 : index
    %1 = vector.load %arg6[%c0, %c0_0, %c0_1] : memref<6x6x32xf32, #tpu.memory_space<vmem>>, vector<6x6x32xf32>
    tpu.vector_store %arg6[%c0, %c0_0, %c0_1], %0 {strides = array<i32>} : memref<6x6x32xf32, #tpu.memory_space<vmem>>, vector<6x6x32xf32>,
    %c0_2 = arith.constant 0 : index
    %c0_3 = arith.constant 0 : index
    %c0_4 = arith.constant 0 : index
    %c0_5 = arith.constant 0 : index
    %2 = vector.load %arg1[%c0_2, %c0_3, %c0_4, %c0_5] : memref<1x4x4x32xf32, #tpu.memory_space<vmem>>, vector<1x4x4x32xf32>
    %3 = vector.shape_cast %2 : vector<1x4x4x32xf32> to vector<4x4x32xf32>
    %c1 = arith.constant 1 : index
    %c1_6 = arith.constant 1 : index
    %c0_7 = arith.constant 0 : index
    %4 = vector.load %arg6[%c1, %c1_6, %c0_7] : memref<6x6x32xf32, #tpu.memory_space<vmem>>, vector<4x4x32xf32>
    tpu.vector_store %arg6[%c1, %c1_6, %c0_7], %3 {strides = array<i32>} : memref<6x6x32xf32, #tpu.memory_space<vmem>>, vector<4x4x32xf32>,
    %c0_8 = arith.constant 0 : index
    %c0_9 = arith.constant 0 : index
    %c0_10 = arith.constant 0 : index
    %c0_11 = arith.constant 0 : index
    %5 = vector.load %arg2[%c0_8, %c0_9, %c0_10, %c0_11] : memref<1x4x4x32xf32, #tpu.memory_space<vmem>>, vector<1x4x4x32xf32>
    %6 = vector.shape_cast %5 : vector<1x4x4x32xf32> to vector<4x4x32xf32>
    %7 = vector.shape_cast %6 : vector<4x4x32xf32> to vector<16x32xf32>
    %c0_12 = arith.constant 0 : index
    %c0_13 = arith.constant 0 : index
    %8 = vector.load %arg7[%c0_12, %c0_13] : memref<16x32xf32, #tpu.memory_space<vmem>>, vector<16x32xf32>
    tpu.vector_store %arg7[%c0_12, %c0_13], %7 {strides = array<i32>} : memref<16x32xf32, #tpu.memory_space<vmem>>, vector<16x32xf32>,
    %c0_14 = arith.constant 0 : index
    %c0_15 = arith.constant 0 : index
    %9 = vector.load %arg4[%c0_14, %c0_15] : memref<1x128xf32, #tpu.memory_space<vmem>>, vector<1x128xf32>
    %c0_i32 = arith.constant 0 : i32
    %c6_i32 = arith.constant 6 : i32
    %10 = arith.addi %c0_i32, %c6_i32 : i32
    %c1_i32 = arith.constant 1 : i32
    scf.for %arg8 = %c0_i32 to %10 step %c1_i32  : i32 {
      %cst_17 = arith.constant 0.000000e+00 : f32
      %11 = vector.broadcast %cst_17 : f32 to vector<16x128xf32>
      %12 = vector.broadcast %9 : vector<1x128xf32> to vector<16x128xf32>
      %13 = arith.addf %11, %12 : vector<16x128xf32>
      %c0_18 = arith.constant 0 : index
      %c0_19 = arith.constant 0 : index
      %c0_20 = arith.constant 0 : index
      %14 = vector.load %arg6[%c0_18, %c0_19, %c0_20] : memref<6x6x32xf32, #tpu.memory_space<vmem>>, vector<4x4x32xf32>
      %15 = vector.shape_cast %14 : vector<4x4x32xf32> to vector<16x32xf32>
      %16 = arith.truncf %15 : vector<16x32xf32> to vector<16x32xbf16>
      %c0_21 = arith.constant 0 : index
      %c0_22 = arith.constant 0 : index
      %c0_23 = arith.constant 0 : index
      %c0_24 = arith.constant 0 : index
      %17 = vector.load %arg3[%c0_21, %c0_22, %c0_23, %c0_24] : memref<3x3x32x128xbf16, #tpu.memory_space<vmem>>, vector<1x1x32x128xbf16>
      %18 = vector.shape_cast %17 : vector<1x1x32x128xbf16> to vector<32x128xbf16>
      %cst_25 = arith.constant dense<0.000000e+00> : vector<16x128xf32>
      %19 = tpu.matmul %16, %18, %cst_25 {dimension_numbers = #tpu.dot_dimension_numbers<[1], [0], [0], [1], [0, 0, 1, 1], [], []>} : vector<16x32xbf16>, vector<32x128xbf16>, vector<16x128xf32> -> vector<16x128xf32>
      %20 = arith.addf %13, %19 : vector<16x128xf32>
      %c0_26 = arith.constant 0 : index
      %c1_27 = arith.constant 1 : index
      %c0_28 = arith.constant 0 : index
      %21 = vector.load %arg6[%c0_26, %c1_27, %c0_28] : memref<6x6x32xf32, #tpu.memory_space<vmem>>, vector<4x4x32xf32>
      %22 = vector.shape_cast %21 : vector<4x4x32xf32> to vector<16x32xf32>
      %23 = arith.truncf %22 : vector<16x32xf32> to vector<16x32xbf16>
      %c0_29 = arith.constant 0 : index
      %c1_30 = arith.constant 1 : index
      %c0_31 = arith.constant 0 : index
      %c0_32 = arith.constant 0 : index
      %24 = vector.load %arg3[%c0_29, %c1_30, %c0_31, %c0_32] : memref<3x3x32x128xbf16, #tpu.memory_space<vmem>>, vector<1x1x32x128xbf16>
      %25 = vector.shape_cast %24 : vector<1x1x32x128xbf16> to vector<32x128xbf16>
      %cst_33 = arith.constant dense<0.000000e+00> : vector<16x128xf32>
      %26 = tpu.matmul %23, %25, %cst_33 {dimension_numbers = #tpu.dot_dimension_numbers<[1], [0], [0], [1], [0, 0, 1, 1], [], []>} : vector<16x32xbf16>, vector<32x128xbf16>, vector<16x128xf32> -> vector<16x128xf32>
      %27 = arith.addf %20, %26 : vector<16x128xf32>
      %c0_34 = arith.constant 0 : index
      %c2 = arith.constant 2 : index
      %c0_35 = arith.constant 0 : index
      %28 = vector.load %arg6[%c0_34, %c2, %c0_35] : memref<6x6x32xf32, #tpu.memory_space<vmem>>, vector<4x4x32xf32>
      %29 = vector.shape_cast %28 : vector<4x4x32xf32> to vector<16x32xf32>
      %30 = arith.truncf %29 : vector<16x32xf32> to vector<16x32xbf16>
      %c0_36 = arith.constant 0 : index
      %c2_37 = arith.constant 2 : index
      %c0_38 = arith.constant 0 : index
      %c0_39 = arith.constant 0 : index
      %31 = vector.load %arg3[%c0_36, %c2_37, %c0_38, %c0_39] : memref<3x3x32x128xbf16, #tpu.memory_space<vmem>>, vector<1x1x32x128xbf16>
      %32 = vector.shape_cast %31 : vector<1x1x32x128xbf16> to vector<32x128xbf16>
      %cst_40 = arith.constant dense<0.000000e+00> : vector<16x128xf32>
      %33 = tpu.matmul %30, %32, %cst_40 {dimension_numbers = #tpu.dot_dimension_numbers<[1], [0], [0], [1], [0, 0, 1, 1], [], []>} : vector<16x32xbf16>, vector<32x128xbf16>, vector<16x128xf32> -> vector<16x128xf32>
      %34 = arith.addf %27, %33 : vector<16x128xf32>
      %c1_41 = arith.constant 1 : index
      %c0_42 = arith.constant 0 : index
      %c0_43 = arith.constant 0 : index
      %35 = vector.load %arg6[%c1_41, %c0_42, %c0_43] : memref<6x6x32xf32, #tpu.memory_space<vmem>>, vector<4x4x32xf32>
      %36 = vector.shape_cast %35 : vector<4x4x32xf32> to vector<16x32xf32>
      %37 = arith.truncf %36 : vector<16x32xf32> to vector<16x32xbf16>
      %c1_44 = arith.constant 1 : index
      %c0_45 = arith.constant 0 : index
      %c0_46 = arith.constant 0 : index
      %c0_47 = arith.constant 0 : index
      %38 = vector.load %arg3[%c1_44, %c0_45, %c0_46, %c0_47] : memref<3x3x32x128xbf16, #tpu.memory_space<vmem>>, vector<1x1x32x128xbf16>
      %39 = vector.shape_cast %38 : vector<1x1x32x128xbf16> to vector<32x128xbf16>
      %cst_48 = arith.constant dense<0.000000e+00> : vector<16x128xf32>
      %40 = tpu.matmul %37, %39, %cst_48 {dimension_numbers = #tpu.dot_dimension_numbers<[1], [0], [0], [1], [0, 0, 1, 1], [], []>} : vector<16x32xbf16>, vector<32x128xbf16>, vector<16x128xf32> -> vector<16x128xf32>
      %41 = arith.addf %34, %40 : vector<16x128xf32>
      %c1_49 = arith.constant 1 : index
      %c1_50 = arith.constant 1 : index
      %c0_51 = arith.constant 0 : index
      %42 = vector.load %arg6[%c1_49, %c1_50, %c0_51] : memref<6x6x32xf32, #tpu.memory_space<vmem>>, vector<4x4x32xf32>
      %43 = vector.shape_cast %42 : vector<4x4x32xf32> to vector<16x32xf32>
      %44 = arith.truncf %43 : vector<16x32xf32> to vector<16x32xbf16>
      %c1_52 = arith.constant 1 : index
      %c1_53 = arith.constant 1 : index
      %c0_54 = arith.constant 0 : index
      %c0_55 = arith.constant 0 : index
      %45 = vector.load %arg3[%c1_52, %c1_53, %c0_54, %c0_55] : memref<3x3x32x128xbf16, #tpu.memory_space<vmem>>, vector<1x1x32x128xbf16>
      %46 = vector.shape_cast %45 : vector<1x1x32x128xbf16> to vector<32x128xbf16>
      %cst_56 = arith.constant dense<0.000000e+00> : vector<16x128xf32>
      %47 = tpu.matmul %44, %46, %cst_56 {dimension_numbers = #tpu.dot_dimension_numbers<[1], [0], [0], [1], [0, 0, 1, 1], [], []>} : vector<16x32xbf16>, vector<32x128xbf16>, vector<16x128xf32> -> vector<16x128xf32>
      %48 = arith.addf %41, %47 : vector<16x128xf32>
      %c1_57 = arith.constant 1 : index
      %c2_58 = arith.constant 2 : index
      %c0_59 = arith.constant 0 : index
      %49 = vector.load %arg6[%c1_57, %c2_58, %c0_59] : memref<6x6x32xf32, #tpu.memory_space<vmem>>, vector<4x4x32xf32>
      %50 = vector.shape_cast %49 : vector<4x4x32xf32> to vector<16x32xf32>
      %51 = arith.truncf %50 : vector<16x32xf32> to vector<16x32xbf16>
      %c1_60 = arith.constant 1 : index
      %c2_61 = arith.constant 2 : index
      %c0_62 = arith.constant 0 : index
      %c0_63 = arith.constant 0 : index
      %52 = vector.load %arg3[%c1_60, %c2_61, %c0_62, %c0_63] : memref<3x3x32x128xbf16, #tpu.memory_space<vmem>>, vector<1x1x32x128xbf16>
      %53 = vector.shape_cast %52 : vector<1x1x32x128xbf16> to vector<32x128xbf16>
      %cst_64 = arith.constant dense<0.000000e+00> : vector<16x128xf32>
      %54 = tpu.matmul %51, %53, %cst_64 {dimension_numbers = #tpu.dot_dimension_numbers<[1], [0], [0], [1], [0, 0, 1, 1], [], []>} : vector<16x32xbf16>, vector<32x128xbf16>, vector<16x128xf32> -> vector<16x128xf32>
      %55 = arith.addf %48, %54 : vector<16x128xf32>
      %c2_65 = arith.constant 2 : index
      %c0_66 = arith.constant 0 : index
      %c0_67 = arith.constant 0 : index
      %56 = vector.load %arg6[%c2_65, %c0_66, %c0_67] : memref<6x6x32xf32, #tpu.memory_space<vmem>>, vector<4x4x32xf32>
      %57 = vector.shape_cast %56 : vector<4x4x32xf32> to vector<16x32xf32>
      %58 = arith.truncf %57 : vector<16x32xf32> to vector<16x32xbf16>
      %c2_68 = arith.constant 2 : index
      %c0_69 = arith.constant 0 : index
      %c0_70 = arith.constant 0 : index
      %c0_71 = arith.constant 0 : index
      %59 = vector.load %arg3[%c2_68, %c0_69, %c0_70, %c0_71] : memref<3x3x32x128xbf16, #tpu.memory_space<vmem>>, vector<1x1x32x128xbf16>
      %60 = vector.shape_cast %59 : vector<1x1x32x128xbf16> to vector<32x128xbf16>
      %cst_72 = arith.constant dense<0.000000e+00> : vector<16x128xf32>
      %61 = tpu.matmul %58, %60, %cst_72 {dimension_numbers = #tpu.dot_dimension_numbers<[1], [0], [0], [1], [0, 0, 1, 1], [], []>} : vector<16x32xbf16>, vector<32x128xbf16>, vector<16x128xf32> -> vector<16x128xf32>
      %62 = arith.addf %55, %61 : vector<16x128xf32>
      %c2_73 = arith.constant 2 : index
      %c1_74 = arith.constant 1 : index
      %c0_75 = arith.constant 0 : index
      %63 = vector.load %arg6[%c2_73, %c1_74, %c0_75] : memref<6x6x32xf32, #tpu.memory_space<vmem>>, vector<4x4x32xf32>
      %64 = vector.shape_cast %63 : vector<4x4x32xf32> to vector<16x32xf32>
      %65 = arith.truncf %64 : vector<16x32xf32> to vector<16x32xbf16>
      %c2_76 = arith.constant 2 : index
      %c1_77 = arith.constant 1 : index
      %c0_78 = arith.constant 0 : index
      %c0_79 = arith.constant 0 : index
      %66 = vector.load %arg3[%c2_76, %c1_77, %c0_78, %c0_79] : memref<3x3x32x128xbf16, #tpu.memory_space<vmem>>, vector<1x1x32x128xbf16>
      %67 = vector.shape_cast %66 : vector<1x1x32x128xbf16> to vector<32x128xbf16>
      %cst_80 = arith.constant dense<0.000000e+00> : vector<16x128xf32>
      %68 = tpu.matmul %65, %67, %cst_80 {dimension_numbers = #tpu.dot_dimension_numbers<[1], [0], [0], [1], [0, 0, 1, 1], [], []>} : vector<16x32xbf16>, vector<32x128xbf16>, vector<16x128xf32> -> vector<16x128xf32>
      %69 = arith.addf %62, %68 : vector<16x128xf32>
      %c2_81 = arith.constant 2 : index
      %c2_82 = arith.constant 2 : index
      %c0_83 = arith.constant 0 : index
      %70 = vector.load %arg6[%c2_81, %c2_82, %c0_83] : memref<6x6x32xf32, #tpu.memory_space<vmem>>, vector<4x4x32xf32>
      %71 = vector.shape_cast %70 : vector<4x4x32xf32> to vector<16x32xf32>
      %72 = arith.truncf %71 : vector<16x32xf32> to vector<16x32xbf16>
      %c2_84 = arith.constant 2 : index
      %c2_85 = arith.constant 2 : index
      %c0_86 = arith.constant 0 : index
      %c0_87 = arith.constant 0 : index
      %73 = vector.load %arg3[%c2_84, %c2_85, %c0_86, %c0_87] : memref<3x3x32x128xbf16, #tpu.memory_space<vmem>>, vector<1x1x32x128xbf16>
      %74 = vector.shape_cast %73 : vector<1x1x32x128xbf16> to vector<32x128xbf16>
      %cst_88 = arith.constant dense<0.000000e+00> : vector<16x128xf32>
      %75 = tpu.matmul %72, %74, %cst_88 {dimension_numbers = #tpu.dot_dimension_numbers<[1], [0], [0], [1], [0, 0, 1, 1], [], []>} : vector<16x32xbf16>, vector<32x128xbf16>, vector<16x128xf32> -> vector<16x128xf32>
      %76 = arith.addf %69, %75 : vector<16x128xf32>
      %77 = arith.negf %76 : vector<16x128xf32>
      %78 = math.exp %77 : vector<16x128xf32>
      %cst_89 = arith.constant 1.000000e+00 : f32
      %79 = vector.broadcast %cst_89 : f32 to vector<16x128xf32>
      %80 = arith.addf %79, %78 : vector<16x128xf32>
      %81 = arith.divf %79, %80 : vector<16x128xf32>
      %82 = math.tanh %76 : vector<16x128xf32>
      %83 = vector.extract_strided_slice %81 {offsets = [0, 0], sizes = [16, 32], strides = [1, 1]} : vector<16x128xf32> to vector<16x32xf32>
      %84 = vector.extract_strided_slice %81 {offsets = [0, 32], sizes = [16, 32], strides = [1, 1]} : vector<16x128xf32> to vector<16x32xf32>
      %85 = vector.extract_strided_slice %82 {offsets = [0, 64], sizes = [16, 32], strides = [1, 1]} : vector<16x128xf32> to vector<16x32xf32>
      %86 = vector.extract_strided_slice %81 {offsets = [0, 96], sizes = [16, 32], strides = [1, 1]} : vector<16x128xf32> to vector<16x32xf32>
      %c0_90 = arith.constant 0 : index
      %c0_91 = arith.constant 0 : index
      %87 = vector.load %arg7[%c0_90, %c0_91] : memref<16x32xf32, #tpu.memory_space<vmem>>, vector<16x32xf32>
      %88 = arith.mulf %84, %87 : vector<16x32xf32>
      %89 = arith.mulf %83, %85 : vector<16x32xf32>
      %90 = arith.addf %88, %89 : vector<16x32xf32>
      %91 = math.tanh %90 : vector<16x32xf32>
      %92 = arith.mulf %86, %91 : vector<16x32xf32>
      %c0_92 = arith.constant 0 : index
      %c0_93 = arith.constant 0 : index
      %93 = vector.load %arg7[%c0_92, %c0_93] : memref<16x32xf32, #tpu.memory_space<vmem>>, vector<16x32xf32>
      tpu.vector_store %arg7[%c0_92, %c0_93], %90 {strides = array<i32>} : memref<16x32xf32, #tpu.memory_space<vmem>>, vector<16x32xf32>,
      %94 = vector.shape_cast %92 : vector<16x32xf32> to vector<4x4x32xf32>
      %c4_i32 = arith.constant 4 : i32
      %95 = arith.muli %arg8, %c4_i32 : i32
      %c0_i32_94 = arith.constant 0 : i32
      %96 = arith.addi %95, %c0_i32_94 : i32
      %c0_95 = arith.constant 0 : index
      %97 = arith.index_cast %96 : i32 to index
      %c0_96 = arith.constant 0 : index
      %c0_97 = arith.constant 0 : index
      %98 = vector.load %arg5[%c0_95, %97, %c0_96, %c0_97] : memref<1x24x4x32xf32, #tpu.memory_space<vmem>>, vector<1x4x4x32xf32>
      %99 = vector.shape_cast %98 : vector<1x4x4x32xf32> to vector<4x4x32xf32>
      %100 = vector.shape_cast %94 : vector<4x4x32xf32> to vector<1x4x4x32xf32>
      tpu.vector_store %arg5[%c0_95, %97, %c0_96, %c0_97], %100 {strides = array<i32>} : memref<1x24x4x32xf32, #tpu.memory_space<vmem>>, vector<1x4x4x32xf32>,
      %c4_i32_98 = arith.constant 4 : i32
      %101 = arith.muli %arg8, %c4_i32_98 : i32
      %c0_99 = arith.constant 0 : index
      %102 = arith.index_cast %101 : i32 to index
      %c0_100 = arith.constant 0 : index
      %c0_101 = arith.constant 0 : index
      %103 = vector.load %arg5[%c0_99, %102, %c0_100, %c0_101] : memref<1x24x4x32xf32, #tpu.memory_space<vmem>>, vector<1x4x4x32xf32>
      %104 = vector.shape_cast %103 : vector<1x4x4x32xf32> to vector<4x4x32xf32>
      %c1_102 = arith.constant 1 : index
      %c1_103 = arith.constant 1 : index
      %c0_104 = arith.constant 0 : index
      %105 = vector.load %arg6[%c1_102, %c1_103, %c0_104] : memref<6x6x32xf32, #tpu.memory_space<vmem>>, vector<4x4x32xf32>
      tpu.vector_store %arg6[%c1_102, %c1_103, %c0_104], %104 {strides = array<i32>} : memref<6x6x32xf32, #tpu.memory_space<vmem>>, vector<4x4x32xf32>,
    }
    %c6_i32_16 = arith.constant 6 : i32
    return
  }
  func.func @transform_0(%arg0: i32) -> (i32, i32, i32, i32) {
    %c0_i32 = arith.constant 0 : i32
    %c0_i32_0 = arith.constant 0 : i32
    %c0_i32_1 = arith.constant 0 : i32
    %c0_i32_2 = arith.constant 0 : i32
    return %arg0, %c0_i32, %c0_i32_0, %c0_i32_1 : i32, i32, i32, i32
  }
  func.func @transform_1(%arg0: i32) -> (i32, i32, i32, i32) {
    %c0_i32 = arith.constant 0 : i32
    %c0_i32_0 = arith.constant 0 : i32
    %c0_i32_1 = arith.constant 0 : i32
    %c0_i32_2 = arith.constant 0 : i32
    return %arg0, %c0_i32, %c0_i32_0, %c0_i32_1 : i32, i32, i32, i32
  }
  func.func @transform_2(%arg0: i32) -> (i32, i32, i32, i32) {
    %c0_i32 = arith.constant 0 : i32
    %c0_i32_0 = arith.constant 0 : i32
    %c0_i32_1 = arith.constant 0 : i32
    %c0_i32_2 = arith.constant 0 : i32
    %c0_i32_3 = arith.constant 0 : i32
    return %c0_i32, %c0_i32_0, %c0_i32_1, %c0_i32_2 : i32, i32, i32, i32
  }
  func.func @transform_3(%arg0: i32) -> (i32, i32) {
    %c0_i32 = arith.constant 0 : i32
    %c0_i32_0 = arith.constant 0 : i32
    %c0_i32_1 = arith.constant 0 : i32
    return %c0_i32, %c0_i32_0 : i32, i32
  }
  func.func @transform_4(%arg0: i32) -> (i32, i32, i32, i32) {
    %c0_i32 = arith.constant 0 : i32
    %c0_i32_0 = arith.constant 0 : i32
    %c0_i32_1 = arith.constant 0 : i32
    %c0_i32_2 = arith.constant 0 : i32
    return %arg0, %c0_i32, %c0_i32_0, %c0_i32_1 : i32, i32, i32, i32
  }
}

</mosaic_0001>

<bundles_post_ra>
// kernel: tpu_custom_call.1
= control target key start
LH: loop header
LB: loop body
LE: loop exit
PB: predicated region body
PF: predicated region fallthrough
CT: control target
= control target key end

     0   :  { %s2103_s0 = inlined_call_operand.hbm [shape: f32[2,4,4,32], index: 0, kind: input, shape index: {}]   ;;  %s2104_s1 = inlined_call_operand.hbm [shape: f32[2,4,4,32], index: 1, kind: input, shape index: {}]   ;;  %s2105_s2 = inlined_call_operand.hbm [shape: bf16[3,3,32,128], index: 2, kind: input, shape index: {}]   ;;  %s2106_s3 = inlined_call_operand.vmem [shape: f32[1,128], index: 3, kind: input, shape index: {}]   ;;  %s2107_s4 = inlined_call_operand.hbm [shape: f32[2,24,4,32], index: 4, kind: output, shape index: {}]  }
   0x1   :  { %2115 = sst [smem:[#allocation16_spill]] %s2103_s0 }
   0x2   :  { %2116 = sst [smem:[#allocation17_spill]] %s2105_s2 }
   0x3   :  { %9 = vsyncpa [#allocation5], 0 }
   0x4   :  { %11 = vsyncpa [#allocation5 + $0x1], 0 }
   0x5   :  { %12 = vsyncpa [#allocation8], 0 }
   0x6   :  { %14 = vsyncpa [#allocation8 + $0x1], 0 }
   0x7   :  { %15 = vsyncpa [#allocation6], 0 }
   0x8   :  { %17 = vsyncpa [#allocation6 + $0x1], 0  ;;  %s1756_s15 = smov 0   ;;  %s1758_s16 = smov 0  }
   0x9   :  { %s1760_s17 = smov 0   ;;  %s1762_s18 = smov 0  }
   0xa LB: > { %s1777_s19 = sadd.s32 4294967295, %s1711_s18   ;;  %s1226_s20 = sadd.s32 4294967294, %s1711_s18   ;;  %s1711_s18 = sphi %s1762_s18, %s2139_s18   ;;  %s1707_s17 = sphi %s1760_s17, %s2138_s17   ;;  %s1703_s16 = sphi %s1758_s16, %s2137_s16   ;;  %s1699_s15 = sphi %s1756_s15, %s2136_s15  }
   0xb   : > { %p43_p0 = scmp.ne.s32.totalorder %s1703_s16, %s1699_s15  ;;  %p2108_p1 = scmp.eq.s32.totalorder %s1777_s19, 0 }
   0xc   : > { %p141_p3 = scmp.eq.s32.totalorder %s1226_s20, 1  ;;  %p1227_p5 = scmp.ge.s32.totalorder %s1711_s18, 1 }
   0xd   : > { %p1786_p4 = por %p2108_p1, %p43_p0  ;;  %p148_p7 = scmp.lt.s32.totalorder %s1711_s18, 3 }
   0xe   : > { %p1791_p6 = por %p141_p3, %p43_p0  ;;  %s1717_s24 = smov [#allocation9]  }
   0xf   : > { %s2117_s21 = scalar_select %p1786_p4, 1, 0 }
  0x10   : > { %s2118_s22 = scalar_select %p1791_p6, 1, 0 }
  0x11   : > { %p1796_p8 = pnand %p1227_p5, %p148_p7  ;;  %s160_s25 = sshll.u32 %s1717_s24, 4  ;;  %s1800_s25 = int_to_ptr.vmem [resolvable:$true] %s160_s25 }
  0x12   : > { %s1812_s27 = sadd.s32 1, %s1711_s18   ;;  %s30_s28 = sadd.s32 1, %s1707_s17 }
  0x13   : > { %s2119_s23 = scalar_select %p1796_p8, 1, 0 }
  0x14   : > { %p1421_p9 = pneg %p1796_p8  ;;  %s27_s29 = ssub.s32 %s1711_s18, %s1812_s27 }
  0x15   : > { %s2121_s2 = sld [smem:[#allocation17_spill]] }
  0x16   : > { %p1807_p11 = pnand %p1421_p9, %p2108_p1 }
  0x18   : > { %p1547_p13 = pneg %p1807_p11 }
  0x1b   : > { %s1545_s6 = scalar_lea.hbm %s2121_s2, 2304 }
  0x1c   : > { %p1546_p12 = scmp.ne.s32.totalorder %s2121_s2, %s1545_s6  ;;  %p1552_p5 = scmp.lt.u32.totalorder %s1545_s6, %s2121_s2 }
  0x1e   : > { %p1548_p0 = pnand %p1547_p13, %p1546_p12 }
  0x20   : > { %p1549_p3 = pneg %p1548_p0 }
  0x22   : > { %p1554_p7 = pnand %p1552_p5, %p1549_p3 }
  0x24   : > { %1557 = shalt.err (!%p1554_p7)
}
  0x25   : > { %s1558_s11 = scalar_lea.vmem %s1800_s25, 2304  ;;  %p1566_p2 = scmp.lt.s32.totalorder %s1800_s25, %s1800_s25 }
  0x26   : > { %p1559_p9 = scmp.ne.s32.totalorder %s1800_s25, %s1558_s11  ;;  %p1567_p6 = scmp.lt.s32.totalorder %s1558_s11, %s1558_s11 }
  0x28   : > { %p1561_p10 = pnand %p1559_p9, %p1547_p13  ;;  %p1568_p4 = por %p1567_p6, %p1566_p2 }
  0x2a   : > { %p1562_p1 = pneg %p1561_p10 }
  0x2c   : > { %p1569_p8 = pnand %p1568_p4, %p1562_p1 }
  0x2e   : > { %1572 = shalt.err (!%p1569_p8)
}
  0x2f   : > { %s2111_s12 = smov 64   ;;  %s2113_s13 = smov 4  }
  0x30   : > { %1424 = dma.hbm_to_vmem [thread:$0]  (!%p1807_p11), %s2121_s2, 2304, %s1800_s25, [#allocation8], %s2111_s12, %s2111_s12, %s2113_s13  }
  0x31   : > { %p28_p1 = scmp.eq.s32.totalorder %s27_s29, 0  ;;  %p37_p2 = scmp.ne.s32.totalorder %s1707_s17, %s1703_s16 }
  0x32   : > { %p38_p4 = scmp.eq.s32.totalorder %s1711_s18, 0  ;;  %p1437_p6 = scmp.lt.s32.totalorder %s1711_s18, 2 }
  0x33   : > { %s1846_s24 = scalar_select %p28_p1, %s1707_s17, %s30_s28  }
  0x34   : > { %p39_p8 = por %p38_p4, %p37_p2  ;;  %p2123_p10 = scmp.eq.s32.totalorder %s1777_s19, 1 }
  0x35   : > { %2122 = sst [smem:[#allocation15_spill]] %s1846_s24  ;;  %s177_s26 = sand.u32 1, %s1707_s17  }
  0x36   : > { %p1850_p12 = por %p2123_p10, %p37_p2  ;;  %s1275_s5 = sshll.u32 %s1711_s18, 8 }
  0x37   : > { %s1856_s6 = sshll.u32 %s177_s26, 4  ;;  %s2125_s0 = sld [smem:[#allocation16_spill]] }
  0x38   : > { %s181_s28 = scalar_lea.vmem [#allocation4], %s1856_s6  ;;  %p1864_p11 = pnand %p1437_p6, %p39_p8 }
  0x39   : > { %s188_s29 = sshll.u32 %s181_s28, 4  ;;  %s1873_s14 = scalar_lea.hbm %s2104_s1, %s1275_s5  ;;  %s1868_s29 = int_to_ptr.vmem [resolvable:$true] %s188_s29 }
  0x3a   : > { %s1875_s20 = scalar_lea.sflag [#allocation5], %s177_s26  ;;  %p1575_p0 = pneg %p1864_p11 }
  0x3d   : > { %s1861_s25 = scalar_lea.hbm %s2125_s0, %s1275_s5  ;;  %s1578_s12 = scalar_lea.hbm %s2125_s0, 512 }
  0x3e   : > { %s1573_s7 = scalar_lea.hbm %s1861_s25, 256  ;;  %p1579_p7 = scmp.lt.u32.totalorder %s1861_s25, %s2125_s0 }
  0x3f   : > { %p1574_p13 = scmp.ne.s32.totalorder %s1861_s25, %s1573_s7  ;;  %p1580_p9 = scmp.lt.u32.totalorder %s1578_s12, %s1573_s7 }
  0x40   : > { %p1582_p2 = scmp.lt.u32.totalorder %s1573_s7, %s1861_s25 }
  0x41   : > { %p1576_p3 = pnand %p1575_p0, %p1574_p13  ;;  %p1581_p1 = por %p1580_p9, %p1579_p7 }
  0x43   : > { %p1577_p5 = pneg %p1576_p3  ;;  %p1583_p4 = por %p1582_p2, %p1581_p1 }
  0x45   : > { %p1584_p6 = pnand %p1583_p4, %p1577_p5 }
  0x47   : > { %1587 = shalt.err (!%p1584_p6)
}
  0x48   : > { %s1588_s26 = scalar_lea.vmem %s1868_s29, 256  ;;  %s1720_s5 = smov [#allocation4]  }
  0x49   : > { %p1589_p8 = scmp.ne.s32.totalorder %s1868_s29, %s1588_s26  ;;  %s1593_s10 = sshll.u32 %s1720_s5, 4  ;;  %s1594_s10 = int_to_ptr.vmem [resolvable:$false] %s1593_s10 }
  0x4a   : > { %s1595_s2 = scalar_lea.vmem %s1594_s10, 512  ;;  %p1596_p3 = scmp.lt.s32.totalorder %s1868_s29, %s1594_s10 }
  0x4b   : > { %p1591_p10 = pnand %p1589_p8, %p1575_p0  ;;  %p1597_p7 = scmp.lt.s32.totalorder %s1595_s2, %s1588_s26 }
  0x4d   : > { %p1592_p13 = pneg %p1591_p10  ;;  %p1598_p9 = por %p1597_p7, %p1596_p3 }
  0x4f   : > { %p1599_p1 = pnand %p1598_p9, %p1592_p13 }
  0x51   : > { %1602 = shalt.err (!%p1599_p1)
}
  0x52   : > { %s2127_s12 = smov 4   ;;  %s2128_s13 = smov 64  }
  0x53   : > { %1428 = dma.hbm_to_vmem [thread:$0]  (!%p1864_p11), %s1861_s25, 256, %s1868_s29, %s1875_s20, %s2128_s13, %s2128_s13, %s2127_s12  }
  0x54   : > { %s202_s11 = scalar_lea.vmem [#allocation7], %s1856_s6  ;;  %s198_s8 = sand.u32 1, %s1711_s18  }
  0x55   : > { %s209_s7 = sshll.u32 %s202_s11, 4  ;;  %s1910_s28 = scalar_lea.sflag [#allocation8], %s198_s8  ;;  %s1908_s7 = int_to_ptr.vmem [resolvable:$true] %s209_s7 }
  0x56   : > { %s1603_s26 = scalar_lea.hbm %s1873_s14, 256  ;;  %s1608_s2 = scalar_lea.hbm %s2104_s1, 512 }
  0x57   : > { %p1604_p5 = scmp.ne.s32.totalorder %s1873_s14, %s1603_s26  ;;  %p1609_p6 = scmp.lt.u32.totalorder %s1873_s14, %s2104_s1 }
  0x58   : > { %p1610_p8 = scmp.lt.u32.totalorder %s1608_s2, %s1603_s26  ;;  %p1612_p13 = scmp.lt.u32.totalorder %s1603_s26, %s1873_s14 }
  0x59   : > { %p1606_p2 = pnand %p1604_p5, %p1575_p0 }
  0x5a   : > { %p1611_p10 = por %p1610_p8, %p1609_p6 }
  0x5b   : > { %p1607_p4 = pneg %p1606_p2 }
  0x5c   : > { %p1613_p3 = por %p1612_p13, %p1611_p10 }
  0x5e   : > { %p1614_p7 = pnand %p1613_p3, %p1607_p4 }
  0x60   : > { %1617 = shalt.err (!%p1614_p7)
}
  0x61   : > { %s1618_s6 = scalar_lea.vmem %s1908_s7, 256  ;;  %s1721_s25 = smov [#allocation7]  }
  0x62   : > { %p1619_p9 = scmp.ne.s32.totalorder %s1908_s7, %s1618_s6  ;;  %s1623_s29 = sshll.u32 %s1721_s25, 4  ;;  %s1624_s29 = int_to_ptr.vmem [resolvable:$false] %s1623_s29 }
  0x63   : > { %s1625_s0 = scalar_lea.vmem %s1624_s29, 512  ;;  %p1626_p2 = scmp.lt.s32.totalorder %s1908_s7, %s1624_s29 }
  0x64   : > { %p1621_p1 = pnand %p1619_p9, %p1575_p0  ;;  %p1627_p6 = scmp.lt.s32.totalorder %s1625_s0, %s1618_s6 }
  0x66   : > { %p1622_p5 = pneg %p1621_p1  ;;  %p1628_p8 = por %p1627_p6, %p1626_p2 }
  0x68   : > { %p1629_p10 = pnand %p1628_p8, %p1622_p5 }
  0x6a   : > { %1632 = shalt.err (!%p1629_p10)
}
  0x6b   : > { %1431 = dma.hbm_to_vmem [thread:$0]  (!%p1864_p11), %s1873_s14, 256, %s1908_s7, %s1910_s28, %s2128_s13, %s2128_s13, %s2127_s12  }
  0x6c   : > { %p2129_p0 = scmp.ne.s32.totalorder %s2119_s23, 0 }
  0x6d   : > { %s1942_s24 = sand.u32 (!%p2129_p0), 1, %s1703_s16   ;;  %p2130_p4 = scmp.ne.s32.totalorder (!%p2129_p0), %s2117_s21, 0 }
  0x6e   : > { %221 = sbr.rel (%p2129_p0) target bundleno = 923 (0x39b), region = 36  ;;  %s1237_s20 = sshll.u32 (!%p2129_p0), %s1942_s24, 4 }
  0x6f   : > { %s224_s11 = scalar_lea.sflag (!%p2129_p0), [#allocation5], %s1942_s24  ;;  %s227_s8 = scalar_lea.vmem (!%p2129_p0), [#allocation4], %s1237_s20 }
  0x75   : > { %1682 = dma.done.wait (%p2130_p4), %s224_s11, 256  }
  0x76   : > { %1684 = vsyncadd (%p2130_p4), %s224_s11, 4294967040  ;;  %s232_s9 = sand.u32 1, %s1777_s19   ;;  %s236_s23 = scalar_lea.vmem [#allocation7], %s1237_s20 }
  0x77   : > { %s233_s14 = scalar_lea.sflag [#allocation8], %s232_s9 }
  0x78   : > { %1686 = dma.done.wait (%p2130_p4), %s233_s14, 256  }
  0x79   : > { %1688 = vsyncadd (%p2130_p4), %s233_s14, 4294967040  ;;  %p2131_p11 = scmp.eq.s32.totalorder %s1777_s19, 0 }
  0x7b   : > { %1690 = dma.done.wait (%p2131_p11), [#allocation8], 2304   ;;  %p2132_p13 = pmov %p2131_p11 }
  0x7c   : > { %vm271_vm0 = vcmask 259072   ;;  %s1409_s12 = smul.u32 96, %s1942_s24  ;;  %v1722_v0 = vmov 0.0   ;;  %vm283_vm1 = vcmask 257024   ;;  %vm300_vm2 = vcmask 261120   ;;  %v1491_v6 = vld [vmem:[%s236_s23] sm:$0xff]  }
  0x7d   : > { %1692 = vsyncadd (%p2132_p13), [#allocation8], 4294964992  ;;  %273 = vst.msk [vmem:[#allocation2 + $0x8] sm:$0x3f] %vm271_vm0, %v1722_v0  ;;  %v1963_v1 = vld [vmem:[%s2106_s3] ss:$0 sm:$0xff] }
  0x7e   : > { %272 = vst.msk [vmem:[#allocation2] sm:$0x3f] %vm271_vm0, %v1722_v0  ;;  %274 = vst.msk [vmem:[#allocation2 + $0x10] sm:$0x3f] %vm271_vm0, %v1722_v0  ;;  %v278_v2 = vld [vmem:[%s227_s8] sm:$0xf] }
  0x7f   : > { %275 = vst.msk [vmem:[#allocation2 + $0x18] sm:$0x3f] %vm271_vm0, %v1722_v0  ;;  %276 = vst.msk [vmem:[#allocation2 + $0x20] sm:$0x3f] %vm271_vm0, %v1722_v0  ;;  %v279_v3 = vld [vmem:[%s227_s8 + $0x4] sm:$0xf] }
  0x80   : > { %277 = vst.msk [vmem:[#allocation2 + $0x28] sm:$0x3f] %vm271_vm0, %v1722_v0  ;;  %v280_v4 = vld [vmem:[%s227_s8 + $0x8] sm:$0xf]  ;;  %v281_v5 = vld [vmem:[%s227_s8 + $0xc] sm:$0xf] }
  0x81   : > { %284 = vst.msk [vmem:[#allocation2 + $0x9] sm:$0xf] %vm283_vm1, %v278_v2  ;;  %285 = vst.msk [vmem:[#allocation2 + $0x11] sm:$0xf] %vm283_vm1, %v279_v3  ;;  %v1492_v7 = vld [vmem:[%s236_s23 + $0x8] sm:$0xff]   ;;  %s1971_s7 = scalar_lea.vmem [#allocation10], %s1409_s12 }
  0x82   : > { %286 = vst.msk [vmem:[#allocation2 + $0x19] sm:$0xf] %vm283_vm1, %v280_v4  ;;  %287 = vst.msk [vmem:[#allocation2 + $0x21] sm:$0xf] %vm283_vm1, %v281_v5  ;;  %s1973_s28 = smov 0  }
  0x83   : > { %301 = vst.msk [vmem:[#allocation3] sm:$0xff] %vm300_vm2, %v1491_v6  ;;  %302 = vst.msk [vmem:[#allocation3 + $0x8] sm:$0xff] %vm300_vm2, %v1492_v7 }
  0x84 LB: >> { %v1493_v8 = vld [vmem:[#allocation9] sm:$0xff]   ;;  %v1723_v9 = vmov 0.0   ;;  %v1495_v11 = vld [vmem:[#allocation9 + $0x8] sm:$0xff]   ;;  %vm1724_vm3 = vmmov 0   ;;  %v1501_v18 = vld [vmem:[#allocation9 + $0x50] sm:$0xff]   ;;  %s1725_s26 = smov 32   ;;  %s1715_s28 = sphi %s1973_s28, %s309_s28  }
  0x85   : >> { %1305 = vmatprep.subr.bf16.mxu1 %v1723_v9  ;;  %1337 = vmatprep.subr.bf16.mxu0 %v1723_v9  ;;  %v1494_v10 = vld [vmem:[#allocation9 + $0x40] sm:$0xff]   ;;  %v1496_v12 = vld [vmem:[#allocation9 + $0x48] sm:$0xff]   ;;  %v1502_v20 = vld [vmem:[#allocation9 + $0x10] sm:$0xff]   ;;  %s1726_s5 = smov 64   ;;  %s1727_s10 = smov 96  }
  0x86   : >> { %1306 = vmatpush3.bf16.msra.mxu1 %v1493_v8  ;;  %1309 = vmatprep.mubr.msk.bf16.mxu1 %vm1724_vm3, %v1723_v9  ;;  %v1503_v21 = vld [vmem:[#allocation9 + $0x58] sm:$0xff]   ;;  %v1510_v28 = vld [vmem:[#allocation9 + $0x20] sm:$0xff]   ;;  %v1512_v31 = vld [vmem:[#allocation9 + $0x28] sm:$0xff]   ;;  %s1277_s2 = sshll.u32 %s1715_s28, 4  ;;  %s309_s28 = sadd.s32 1, %s1715_s28  }
  0x87   : >> { %1338 = vmatpush3.bf16.msra.mxu0 %v1494_v10  ;;  %1307 = vmatprep.subr.bf16.mxu1 %v1723_v9  ;;  %v1504_v22 = vld [vmem:[#allocation9 + $0x18] sm:$0xff]   ;;  %v1509_v30 = vld [vmem:[#allocation9 + $0x60] sm:$0xff]   ;;  %v1511_v32 = vld [vmem:[#allocation9 + $0x68] sm:$0xff]   ;;  %s1087_s6 = scalar_lea.vmem %s1971_s7, %s1277_s2 [#allocation10]  ;;  %p306_p3 = scmp.ge.s32.totalorder %s309_s28, 6  }
  0x88   : >> { %1339 = vmatprep.subr.bf16.mxu0 %v1723_v9  ;;  %1341 = vmatprep.mubr.msk.bf16.mxu0 %vm1724_vm3, %v1723_v9  ;;  %v1497_v13 = vld [vmem:[#allocation2] ss:$8 sps:$4 sm:$0xff]   ;;  %v1518_v38 = vld [vmem:[#allocation9 + $0x30] sm:$0xff]   ;;  %v1520_v41 = vld [vmem:[#allocation9 + $0x38] sm:$0xff]   ;;  %s1410_s25 = smul.u32 (%p306_p3), 1536, %s1777_s19  ;;  %s1114_s29 = sshll.u32 (%p306_p3), %s1971_s7, 4  ;;  %s2059_s29 = int_to_ptr.vmem [resolvable:$true] %s1114_s29 }
  0x89   : >> { %v1498_v14 = vld [vmem:[#allocation2 + $0x10] ss:$8 sps:$4 sm:$0xff]   ;;  %v1505_v23 = vld [vmem:[#allocation2 + $0x1] ss:$8 sps:$4 sm:$0xff]   ;;  %s1101_s8 = scalar_lea.sflag (%p306_p3), [#allocation6], %s1942_s24  ;;  %s1633_s9 = scalar_lea.vmem (%p306_p3), %s2059_s29, 1536 }
  0x8a   : >> { %1308 = vmatpush3.bf16.msra.mxu1 %v1495_v11  ;;  %v329_v15 = vpack.c.bf16 %v1498_v14, %v1497_v13  ;;  %v1499_v16 = vld [vmem:[#allocation2 + $0x9] ss:$8 sps:$4 sm:$0xff]   ;;  %v1500_v17 = vld [vmem:[#allocation2 + $0x19] ss:$8 sps:$4 sm:$0xff]   ;;  %s2057_s11 = scalar_lea.hbm (%p306_p3), %s2107_s4, %s1410_s25  ;;  %p1634_p7 = scmp.ne.s32.totalorder (%p306_p3), %s2059_s29, %s1633_s9 }
  0x8b   : >> { %1340 = vmatpush3.bf16.msra.mxu0 %v1496_v12  ;;  %1313 = vmatprep.subr.bf16.mxu1 %v1723_v9  ;;  %v632_v19 = vpack.c.bf16 %v1500_v17, %v1499_v16  ;;  %v1506_v24 = vld [vmem:[#allocation2 + $0x11] ss:$8 sps:$4 sm:$0xff]   ;;  %v1513_v33 = vld [vmem:[#allocation2 + $0x2] ss:$8 sps:$4 sm:$0xff]   ;;  %s1728_s14 = smov (%p306_p3), [#allocation10]  }
  0x8c   : >> { %1345 = vmatprep.subr.bf16.mxu0 %v1723_v9  ;;  %v1507_v25 = vld [vmem:[#allocation2 + $0xa] ss:$8 sps:$4 sm:$0xff]   ;;  %v1508_v26 = vld [vmem:[#allocation2 + $0x1a] ss:$8 sps:$4 sm:$0xff]   ;;  %v404_v27 = vpack.c.bf16 %v1506_v24, %v1505_v23  ;;  %p1635_p9 = pnand (%p306_p3), %p1634_p7, %p1850_p12  ;;  %s1637_s23 = sshll.u32 (%p306_p3), %s1728_s14, 4  ;;  %s1638_s23 = int_to_ptr.vmem [resolvable:$false] %s1637_s23 }
  0x8d   : >> { %1310 = vmatmul.mubr.msk.bf16.vlgmr.msra.gmra.mrb[0].mxu1 %vm300_vm2, %v329_v15  ;;  %v708_v29 = vpack.c.bf16 %v1508_v26, %v1507_v25  ;;  %v1514_v34 = vld [vmem:[#allocation2 + $0x12] ss:$8 sps:$4 sm:$0xff]   ;;  %v1516_v36 = vld [vmem:[#allocation2 + $0x20] ss:$8 sps:$4 sm:$0xff]   ;;  %s1639_s19 = scalar_lea.vmem (%p306_p3), %s1638_s23, 3072  ;;  %p1640_p5 = scmp.lt.s32.totalorder (%p306_p3), %s2059_s29, %s1638_s23 }
  0x8e   : >> { %1317 = vmatprep.mubr.msk.bf16.mxu1 %vm1724_vm3, %v1723_v9  ;;  %1342 = vmatmul.mubr.msk.bf16.vlgmr.msra.gmra.mrb[0].mxu0 %vm300_vm2, %v632_v19  ;;  %v1515_v35 = vld [vmem:[#allocation2 + $0x10] ss:$8 sps:$4 sm:$0xff]   ;;  %v480_v37 = vpack.c.bf16 %v1514_v34, %v1513_v33  ;;  %v1524_v48 = vld [vmem:[#allocation2 + $0x21] ss:$8 sps:$4 sm:$0xff]   ;;  %p1636_p1 = pneg (%p306_p3), %p1635_p9  ;;  %p1641_p2 = scmp.lt.s32.totalorder (%p306_p3), %s1639_s19, %s1633_s9 }
  0x8f   : >> { %1314 = vmatpush3.bf16.msra.mxu1 %v1502_v20  ;;  %1346 = vmatpush3.bf16.msra.mxu0 %v1501_v18  ;;  %v785_v39 = vpack.c.bf16 %v1516_v36, %v1515_v35  ;;  %v1517_v40 = vld [vmem:[#allocation9 + $0x70] sm:$0xff]   ;;  %v1519_v42 = vld [vmem:[#allocation9 + $0x78] sm:$0xff]   ;;  %v1525_v51 = vld [vmem:[#allocation9 + $0x80] sm:$0xff]  }
  0x90   : >> { %1315 = vmatprep.subr.bf16.mxu1 %v1723_v9  ;;  %1347 = vmatprep.subr.bf16.mxu0 %v1723_v9  ;;  %v1015_v43 = vld [vmem:[#allocation3] sm:$0xff]  ;;  %v1522_v45 = vld [vmem:[#allocation2 + $0x18] ss:$8 sps:$4 sm:$0xff]   ;;  %v1526_v52 = vld [vmem:[#allocation9 + $0x88] sm:$0xff]   ;;  %p1642_p6 = por (%p306_p3), %p1641_p2, %p1640_p5 }
  0x91   : >> { %1349 = vmatprep.mubr.msk.bf16.mxu0 %vm1724_vm3, %v1723_v9  ;;  %v1521_v44 = vld [vmem:[#allocation2 + $0x8] ss:$8 sps:$4 sm:$0xff]   ;;  %1019 = vrot.lane.b32.xlu1 %v1015_v43, %s1725_s26  ;;  %v1016_v46 = vld [vmem:[#allocation3 + $0x8] sm:$0xff] }
  0x92   : >> { %v1523_v47 = vld [vmem:[#allocation2 + $0x11] ss:$8 sps:$4 sm:$0xff]   ;;  %v556_v49 = vpack.c.bf16 %v1522_v45, %v1521_v44  ;;  %v1528_v54 = vld [vmem:[#allocation2 + $0x22] ss:$8 sps:$4 sm:$0xff]   ;;  %p1643_p8 = pnand (%p306_p3), %p1642_p6, %p1636_p1 }
  0x93   : >> { %1316 = vmatpush3.bf16.msra.mxu1 %v1504_v22  ;;  %1348 = vmatpush3.bf16.msra.mxu0 %v1503_v21  ;;  %v861_v50 = vpack.c.bf16 %v1524_v48, %v1523_v47  ;;  %v1527_v53 = vld [vmem:[#allocation2 + $0x12] ss:$8 sps:$4 sm:$0xff]  }
  0x94   : >> { %1321 = vmatprep.subr.bf16.mxu1 %v1723_v9  ;;  %1353 = vmatprep.subr.bf16.mxu0 %v1723_v9  ;;  %v937_v55 = vpack.c.bf16 %v1528_v54, %v1527_v53 }
  0x95   : >> { %1021 = vrot.lane.b32.xlu1 %v1016_v46, %s1725_s26 }
  0x99   : >> { %1318 = vmatmul.mubr.msk.bf16.vlgmr.msra.gmra.mrb[0].mxu1 %vm300_vm2, %v404_v27 }
  0x9a   : >> { %1322 = vmatpush3.bf16.msra.mxu1 %v1510_v28  ;;  %1325 = vmatprep.mubr.msk.bf16.mxu1 %vm1724_vm3, %v1723_v9 }
  0x9b   : >> { %1350 = vmatmul.mubr.msk.bf16.vlgmr.msra.gmra.mrb[0].mxu0 %vm300_vm2, %v708_v29  ;;  %1323 = vmatprep.subr.bf16.mxu1 %v1723_v9 }
  0x9c   : >> { %1354 = vmatpush3.bf16.msra.mxu0 %v1509_v30  ;;  %1357 = vmatprep.mubr.msk.bf16.mxu0 %vm1724_vm3, %v1723_v9 }
  0x9d   : >> { %1355 = vmatprep.subr.bf16.mxu0 %v1723_v9 }
  0x9e   : >> { %1324 = vmatpush3.bf16.msra.mxu1 %v1512_v31 }
  0x9f   : >> { %1329 = vmatprep.subr.bf16.mxu1 %v1723_v9 }
  0xa0   : >> { %1356 = vmatpush3.bf16.msra.mxu0 %v1511_v32 }
  0xa1   : >> { %1361 = vmatprep.subr.bf16.mxu0 %v1723_v9 }
  0xa5   : >> { %1326 = vmatmul.mubr.msk.bf16.vlgmr.msra.gmra.mrb[0].mxu1 %vm300_vm2, %v480_v37 }
  0xa6   : >> { %1330 = vmatpush3.bf16.msra.mxu1 %v1518_v38  ;;  %1333 = vmatprep.mubr.msk.bf16.mxu1 %vm1724_vm3, %v1723_v9 }
  0xa7   : >> { %1358 = vmatmul.mubr.msk.bf16.vlgmr.msra.gmra.mrb[0].mxu0 %vm300_vm2, %v785_v39  ;;  %1331 = vmatprep.subr.bf16.mxu1 %v1723_v9 }
  0xa8   : >> { %1362 = vmatpush3.bf16.msra.mxu0 %v1517_v40  ;;  %1365 = vmatprep.mubr.msk.bf16.mxu0 %vm1724_vm3, %v1723_v9 }
  0xa9   : >> { %1363 = vmatprep.subr.bf16.mxu0 %v1723_v9 }
  0xaa   : >> { %1332 = vmatpush3.bf16.msra.mxu1 %v1520_v41 }
  0xac   : >> { %1364 = vmatpush3.bf16.msra.mxu0 %v1519_v42 }
  0xad   : >> { %1369 = vmatprep.subr.bf16.mxu0 %v1723_v9 }
  0xb1   : >> { %1334 = vmatmul.mubr.msk.bf16.vlgmr.msra.gmra.mrb[0].mxu1 %vm300_vm2, %v556_v49 }
  0xb3   : >> { %1366 = vmatmul.mubr.msk.bf16.vlgmr.msra.gmra.mrb[0].mxu0 %vm300_vm2, %v861_v50 }
  0xb4   : >> { %1370 = vmatpush3.bf16.msra.mxu0 %v1525_v51  ;;  %1373 = vmatprep.mubr.msk.bf16.mxu0 %vm1724_vm3, %v1723_v9 }
  0xb5   : >> { %1371 = vmatprep.subr.bf16.mxu0 %v1723_v9 }
  0xb8   : >> { %1372 = vmatpush3.bf16.msra.mxu0 %v1526_v52 }
  0xbf   : >> { %1374 = vmatmul.mubr.msk.bf16.vlgmr.msra.gmra.mrb[0].mxu0 %vm300_vm2, %v937_v55 }
 0x103   : >> { %v1020_v19 = vpop.permute.xlu1 %1019 }
 0x107   : >> { %v1022_v21 = vpop.permute.xlu1 %1021 }
 0x184   : >> { %v611_v56 = vpop.f32.mrb[0].mxu1 }
 0x185   : >> { %v1335_v57 = vpop.f32.mrb[1].mxu1  ;;  %v1377_v60 = vadd.f32 %v1963_v1, %v611_v56 }
 0x186   : >> { %v614_v58 = vpop.f32.mrb[2].mxu1 }
 0x187   : >> { %v1336_v59 = vpop.f32.mrb[3].mxu1  ;;  %v1379_v62 = vadd.f32 %v1963_v1, %v614_v58 }
 0x192   : >> { %v992_v61 = vpop.f32.mrb[0].mxu0 }
 0x193   : >> { %v1378_v63 = vadd.f32 %v1377_v60, %v992_v61  ;;  %v1375_v0 = vpop.f32.mrb[1].mxu0 }
 0x194   : >> { %v995_v2 = vpop.f32.mrb[2].mxu0 }
 0x195   : >> { %1529 = vtanh.f32 %v1378_v63  ;;  %v1380_v3 = vadd.f32 %v1379_v62, %v995_v2  ;;  %v1376_v4 = vpop.f32.mrb[3].mxu0  ;;  %v1268_v7 = vmul.f32 -1.442695, %v1378_v63 }
 0x197   : >> { %1531 = vtanh.f32 %v1380_v3  ;;  %v1269_v8 = vmul.f32 -1.442695, %v1380_v3 }
 0x198   : >> { %1533 = vpow2.f32 %v1268_v7 }
 0x199   : >> { %1535 = vpow2.f32 %v1269_v8 }
 0x19f   : >> { %v1530_v5 = vpop.eup %1529 }
 0x1a0   : >> { %1029 = vrot.lane.b32.xlu0 %v1530_v5, %s1726_s5 }
 0x1a1   : >> { %v1532_v6 = vpop.eup %1531 }
 0x1a2   : >> { %v1534_v9 = vpop.eup %1533 }
 0x1a3   : >> { %v1007_v10 = vadd.f32 1.0, %v1534_v9  ;;  %v1536_v11 = vpop.eup %1535 }
 0x1a4   : >> { %1031 = vrot.lane.b32.xlu0 %v1532_v6, %s1726_s5  ;;  %v1008_v12 = vadd.f32 1.0, %v1536_v11 }
 0x1a5   : >> { %1537 = vrcp.f32 %v1007_v10 }
 0x1a6   : >> { %1539 = vrcp.f32 %v1008_v12 }
 0x1af   : >> { %v1538_v13 = vpop.eup %1537 }
 0x1b0   : >> { %v1540_v16 = vpop.eup %1539  ;;  %v1025_v20 = vmul.f32 %v1538_v13, %v1020_v19 }
 0x1b1   : >> { %v1026_v24 = vmul.f32 %v1540_v16, %v1022_v21 }
 0x212   : >> { %v1030_v14 = vpop.permute.xlu0 %1029 }
 0x213   : >> { %v1035_v15 = vmul.f32 %v1538_v13, %v1030_v14 }
 0x215   : >> { %1039 = vrot.lane.b32.xlu0 %v1035_v15, %s1725_s26 }
 0x216   : >> { %v1032_v17 = vpop.permute.xlu0 %1031 }
 0x217   : >> { %v1036_v18 = vmul.f32 %v1540_v16, %v1032_v17 }
 0x219   : >> { %1041 = vrot.lane.b32.xlu1 %v1036_v18, %s1725_s26 }
 0x287   : >> { %v1040_v22 = vpop.permute.xlu0 %1039 }
 0x288   : >> { %v1045_v23 = vadd.f32 %v1040_v22, %v1025_v20 }
 0x28a   : >> { %1541 = vtanh.f32 %v1045_v23 }
 0x28b   : >> { %v1042_v25 = vpop.permute.xlu1 %1041 }
 0x28c   : >> { %v1046_v26 = vadd.f32 %v1042_v25, %v1026_v24 }
 0x28e   : >> { %1543 = vtanh.f32 %v1046_v26 }
 0x294   : >> { %v1542_v27 = vpop.eup %1541 }
 0x295   : >> { %1051 = vrot.lane.b32.xlu0 %v1542_v27, %s1726_s5 }
 0x298   : >> { %v1544_v28 = vpop.eup %1543 }
 0x299   : >> { %1053 = vrot.lane.b32.xlu1 %v1544_v28, %s1726_s5 }
 0x307   : >> { %v1052_v29 = vpop.permute.xlu0 %1051 }
 0x308   : >> { %v1057_v30 = vmul.f32 %v1538_v13, %v1052_v29 }
 0x30a   : >> { %v1072_v31 = vcombine.high %v1057_v30, %v1057_v30  ;;  %1074 = vrot.lane.b32.xlu0 %v1057_v30, %s1725_s26 }
 0x30b   : >> { %v1054_v32 = vpop.permute.xlu1 %1053 }
 0x30c   : >> { %v1058_v33 = vmul.f32 %v1540_v16, %v1054_v32  ;;  %1076 = vrot.lane.b32.xlu1 %v1072_v31, %s1725_s26 }
 0x30e   : >> { %v1073_v34 = vcombine.high %v1058_v33, %v1058_v33  ;;  %1078 = vrot.lane.b32.xlu0 %v1058_v33, %s1725_s26 }
 0x310   : >> { %1080 = vrot.lane.b32.xlu1 %v1073_v34, %s1725_s26 }
 0x312   : >> { %1061 = vrot.lane.b32.xlu0 %v1045_v23, %s1727_s10 }
 0x314   : >> { %1063 = vrot.lane.b32.xlu1 %v1046_v26, %s1727_s10 }
 0x37c   : >> { %v1075_v35 = vpop.permute.xlu0 %1074 }
 0x37d   : >> { %1088 = vst.msk [vmem:[%s1087_s6] sm:$0xf] %vm283_vm1, %v1075_v35 }
 0x37e   : >> { %v1077_v36 = vpop.permute.xlu1 %1076 }
 0x37f   : >> { %1089 = vst.msk [vmem:[%s1087_s6 + $0x4] sm:$0xf] %vm283_vm1, %v1077_v36 }
 0x380   : >> { %v1079_v37 = vpop.permute.xlu0 %1078 }
 0x381   : >> { %1090 = vst.msk [vmem:[%s1087_s6 + $0x8] sm:$0xf] %vm283_vm1, %v1079_v37 }
 0x382   : >> { %v1081_v38 = vpop.permute.xlu1 %1080 }
 0x383   : >> { %1091 = vst.msk [vmem:[%s1087_s6 + $0xc] sm:$0xf] %vm283_vm1, %v1081_v38 }
 0x384   : >> { %v1092_v39 = vld [vmem:[%s1087_s6] sm:$0xf]  ;;  %v1062_v40 = vpop.permute.xlu0 %1061 }
 0x385   : >> { %1096 = vst.msk [vmem:[#allocation2 + $0x9] sm:$0xf] %vm283_vm1, %v1092_v39 }
 0x386   : >> { %1067 = vst.msk [vmem:[#allocation3] sm:$0xff] %vm300_vm2, %v1062_v40  ;;  %v1093_v41 = vld [vmem:[%s1087_s6 + $0x4] sm:$0xf]  ;;  %v1064_v42 = vpop.permute.xlu1 %1063  ;;  %308 = sbr.rel (!%p306_p3) target bundleno = 132 (0x84), region = 116 }
 0x387   : >> { %1097 = vst.msk [vmem:[#allocation2 + $0x11] sm:$0xf] %vm283_vm1, %v1093_v41 }
 0x388   : >> { %1068 = vst.msk [vmem:[#allocation3 + $0x8] sm:$0xff] %vm300_vm2, %v1064_v42  ;;  %v1094_v43 = vld [vmem:[%s1087_s6 + $0x8] sm:$0xf] }
 0x389   : >> { %1098 = vst.msk [vmem:[#allocation2 + $0x19] sm:$0xf] %vm283_vm1, %v1094_v43 }
 0x38a   : >> { %v1095_v44 = vld [vmem:[%s1087_s6 + $0xc] sm:$0xf] }
 0x38b   : >> { %1099 = vst.msk [vmem:[#allocation2 + $0x21] sm:$0xf] %vm283_vm1, %v1095_v44 }
 0x38d   : > { %1646 = shalt.err (!%p1643_p8)
}
 0x38e   : > { %s1647_s12 = scalar_lea.hbm %s2057_s11, 1536  ;;  %s1651_s7 = scalar_lea.hbm %s2107_s4, 3072 }
 0x38f   : > { %p1648_p10 = scmp.ne.s32.totalorder %s2057_s11, %s1647_s12  ;;  %p1652_p11 = scmp.lt.u32.totalorder %s2057_s11, %s2107_s4 }
 0x390   : > { %p1653_p13 = scmp.lt.u32.totalorder %s1651_s7, %s1647_s12  ;;  %p1655_p7 = scmp.lt.u32.totalorder %s1647_s12, %s2057_s11 }
 0x391   : > { %p1649_p0 = pnand %p1648_p10, %p1850_p12 }
 0x392   : > { %p1654_p3 = por %p1653_p13, %p1652_p11 }
 0x393   : > { %p1650_p4 = pneg %p1649_p0 }
 0x394   : > { %p1656_p9 = por %p1655_p7, %p1654_p3 }
 0x396   : > { %p1657_p1 = pnand %p1656_p9, %p1650_p4 }
 0x398   : > { %1660 = shalt.err (!%p1657_p1)
}
 0x399   : > { %s1729_s5 = smov 64   ;;  %s1730_s10 = smov 4  }
 0x39a   : > { %1419 = dma.vmem_to_hbm [thread:$0]  (%p1850_p12), %s2059_s29, 1536, %s2057_s11, %s1101_s8, %s1729_s5, %s1729_s5, %s1730_s10  }
 0x39b PF: > { %s1129_s2 = sand.u32 1, %s1699_s15   ;;  %p2133_p5 = scmp.ne.s32.totalorder %s2118_s22, 0 }
 0x39c   : > { %p2134_p2 = scmp.ge.s32.totalorder %s1711_s18, 2  ;;  %s1130_s6 = scalar_lea.sflag [#allocation6], %s1129_s2 }
 0x39e   : > { %p1433_p6 = pnand %p2134_p2, %p2133_p5 }
 0x3a0   : > { %1694 = dma.done.wait (!%p1433_p6), %s1130_s6, 1536  }
 0x3a1   : > { %1696 = vsyncadd (!%p1433_p6), %s1130_s6, 4294965760  ;;  %s2135_s25 = sld [smem:[#allocation15_spill]]  ;;  %p20_p8 = scmp.ge.s32.totalorder %s1812_s27, 4  }
 0x3a2   : > { %s2136_s15 = smov %s1703_s16  ;;  %s2137_s16 = smov %s1707_s17 }
 0x3a3   : > { %s2139_s18 = smov %s1812_s27  ;;  %22 = sbr.rel (!%p20_p8) target bundleno = 10 (0xa), region = 127 }
 0x3a7   : > { %s2138_s17 = smov %s2135_s25 }
 0x3aa   :  { %1135 = vsyncpa [#allocation5], 1 }
 0x3ab   :  { %1137 = vsyncpa [#allocation5 + $0x1], 1 }
 0x3ac   :  { %1138 = vsyncpa [#allocation8], 1 }
 0x3ad   :  { %1140 = vsyncpa [#allocation8 + $0x1], 1 }
 0x3ae   :  { %1141 = vsyncpa [#allocation6], 1 }
 0x3af   :  { %1143 = vsyncpa [#allocation6 + $0x1], 1 }

</bundles_post_ra>
